<compile_context>
chip_gen: v6e
topology: v6e:2x2x1
jax: 0.10.0
libtpu: 0.0.40
codegen_flags: <defaults>
</compile_context>

<pallas_src>
import functools

import jax
import jax.numpy as jnp
from jax.experimental import pallas as pl
from jax.experimental.pallas import tpu as pltpu

LANES = 128
SUBLANES = 8


def _bce_blur_kernel(pred_ref, true_ref, out_ref, *, alpha, n_valid,
                     tile_elems, has_pad):
    # pred_ref / true_ref: (sub_blocks, 8, 128); out_ref: (1, 8, 128)
    x = pred_ref[...].astype(jnp.float32)
    z = true_ref[...].astype(jnp.float32)

    # Shared exponential: e = exp(-|x|)
    e = jnp.exp(-jnp.abs(x))

    # Numerically-stable BCE-with-logits (matches torch):
    #   max(x, 0) - x*z + log(1 + exp(-|x|))
    bce = jnp.maximum(x, 0.0) - x * z + jnp.log1p(e)

    # sigmoid(x) from the same exponential.
    inv = 1.0 / (1.0 + e)
    p = jnp.where(x >= 0.0, inv, e * inv)

    dx = p - z
    alpha_factor = 1.0 - jnp.exp((dx - 1.0) / (alpha + 0.0001))
    loss = bce * alpha_factor

    if has_pad:
        # Mask out the zero-padded tail (only compiled in when padding exists;
        # padding only lives in the last block, elsewhere idx < n_valid holds).
        g = jax.lax.broadcasted_iota(jnp.int32, loss.shape, 0)
        r = jax.lax.broadcasted_iota(jnp.int32, loss.shape, 1)
        c = jax.lax.broadcasted_iota(jnp.int32, loss.shape, 2)
        idx = pl.program_id(0) * tile_elems + (g * SUBLANES + r) * LANES + c
        loss = jnp.where(idx < n_valid, loss, 0.0)

    # Per-lane / per-sublane partial sums: pure vreg adds over the leading axis.
    out_ref[0] = loss.sum(axis=0)


def bce_blur_with_logits_loss(pred, true, alpha=0.05, *, tile_rows=2048):
    assert pred.shape == true.shape
    n_valid = int(pred.size)

    flat_p = pred.reshape(-1)
    flat_t = true.reshape(-1)

    # Choose a big, 8-aligned row tile; shrink for small inputs.
    rows_needed = pl.cdiv(n_valid, LANES)
    rows_needed8 = pl.cdiv(rows_needed, SUBLANES) * SUBLANES
    tr = min(int(tile_rows), rows_needed8)
    tr = max(SUBLANES, (tr // SUBLANES) * SUBLANES)
    rows = pl.cdiv(rows_needed, tr) * tr
    padded = rows * LANES

    pad = padded - n_valid
    if pad:
        flat_p = jnp.pad(flat_p, (0, pad))
        flat_t = jnp.pad(flat_t, (0, pad))

    sub_blocks = tr // SUBLANES
    num_blocks = rows // tr

    p3 = flat_p.reshape(rows // SUBLANES, SUBLANES, LANES)
    t3 = flat_t.reshape(rows // SUBLANES, SUBLANES, LANES)

    in_spec = pl.BlockSpec((sub_blocks, SUBLANES, LANES), lambda i: (i, 0, 0))
    out_spec = pl.BlockSpec((1, SUBLANES, LANES), lambda i: (i, 0, 0))

    kernel = functools.partial(
        _bce_blur_kernel,
        alpha=float(alpha),
        n_valid=n_valid,
        tile_elems=tr * LANES,
        has_pad=pad > 0,
    )

    partials = pl.pallas_call(
        kernel,
        out_shape=jax.ShapeDtypeStruct((num_blocks, SUBLANES, LANES),
                                       jnp.float32),
        grid_spec=pltpu.PrefetchScalarGridSpec(
            num_scalar_prefetch=0,
            grid=(num_blocks,),
            in_specs=[in_spec, in_spec],
            out_specs=out_spec,
        ),
        compiler_params=pltpu.CompilerParams(
            dimension_semantics=("parallel",)),
    )(p3, t3)

    # Tiny final reduction + mean in plain JAX.
    return jnp.sum(partials) / jnp.float32(n_valid)


def _reference(pred, true, alpha=0.05):
    x = pred.astype(jnp.float32)
    z = true.astype(jnp.float32)
    bce = jnp.maximum(x, 0.0) - x * z + jnp.log1p(jnp.exp(-jnp.abs(x)))
    p = jax.nn.sigmoid(x)
    dx = p - z
    af = 1.0 - jnp.exp((dx - 1.0) / (alpha + 0.0001))
    return jnp.mean(bce * af)


if __name__ == "__main__":
    key = jax.random.PRNGKey(0)
    k1, k2, k3, k4 = jax.random.split(key, 4)

    # Case 1: small NCHW, size divisible by 128 (no padding path).
    pred1 = jax.random.normal(k1, (2, 4, 16, 16), dtype=jnp.float32)
    true1 = (jax.random.uniform(k2, (2, 4, 16, 16)) > 0.5).astype(jnp.float32)
    out1 = jax.block_until_ready(bce_blur_with_logits_loss(pred1, true1))
    ref1 = _reference(pred1, true1)
    assert jnp.allclose(out1, ref1, rtol=1e-5, atol=1e-6), (out1, ref1)

    # Case 2: ragged size to exercise the in-kernel tail mask.
    pred2 = jax.random.normal(k3, (2, 3, 7, 9), dtype=jnp.float32)
    true2 = (jax.random.uniform(k4, (2, 3, 7, 9)) > 0.5).astype(jnp.float32)
    out2 = jax.block_until_ready(bce_blur_with_logits_loss(pred2, true2))
    ref2 = _reference(pred2, true2)
    assert jnp.allclose(out2, ref2, rtol=1e-5, atol=1e-6), (out2, ref2)

    print("KERNEL_OK")
</pallas_src>

<mosaic_0001>
module attributes {stable_mosaic.version = 11 : i64} {
  func.func @_bce_blur_kernel(%arg0: i32, %arg1: memref<2x8x128xf32, #tpu.memory_space<vmem>>, %arg2: memref<2x8x128xf32, #tpu.memory_space<vmem>>, %arg3: memref<1x8x128xf32, #tpu.memory_space<vmem>>) attributes {dimension_semantics = [#tpu.dimension_semantics<parallel>], iteration_bounds = array<i64: 1>, scalar_prefetch = 0 : i64, scratch_operands = 0 : i64, tpu.core_type = #tpu.core_type<tc>, window_params = [{transform_indices = @transform_0, window_bounds = array<i64: 2, 8, 128>}, {transform_indices = @transform_1, window_bounds = array<i64: 2, 8, 128>}, {transform_indices = @transform_2, window_bounds = array<i64: 1, 8, 128>}]} {
    %c0 = arith.constant 0 : index
    %c0_0 = arith.constant 0 : index
    %c0_1 = arith.constant 0 : index
    %0 = vector.load %arg1[%c0, %c0_0, %c0_1] : memref<2x8x128xf32, #tpu.memory_space<vmem>>, vector<2x8x128xf32>
    %c0_2 = arith.constant 0 : index
    %c0_3 = arith.constant 0 : index
    %c0_4 = arith.constant 0 : index
    %1 = vector.load %arg2[%c0_2, %c0_3, %c0_4] : memref<2x8x128xf32, #tpu.memory_space<vmem>>, vector<2x8x128xf32>
    %2 = math.absf %0 : vector<2x8x128xf32>
    %cst = arith.constant 0.000000e+00 : f32
    %3 = vector.broadcast %cst : f32 to vector<2x8x128xf32>
    %4 = arith.subf %3, %2 : vector<2x8x128xf32>
    %5 = math.exp %4 : vector<2x8x128xf32>
    %cst_5 = arith.constant 0.000000e+00 : f32
    %6 = vector.broadcast %cst_5 : f32 to vector<2x8x128xf32>
    %7 = arith.maximumf %0, %6 : vector<2x8x128xf32>
    %8 = arith.mulf %0, %1 : vector<2x8x128xf32>
    %9 = arith.subf %7, %8 : vector<2x8x128xf32>
    %10 = math.log1p %5 : vector<2x8x128xf32>
    %11 = arith.addf %9, %10 : vector<2x8x128xf32>
    %cst_6 = arith.constant 1.000000e+00 : f32
    %12 = vector.broadcast %cst_6 : f32 to vector<2x8x128xf32>
    %13 = arith.addf %12, %5 : vector<2x8x128xf32>
    %cst_7 = arith.constant 1.000000e+00 : f32
    %14 = vector.broadcast %cst_7 : f32 to vector<2x8x128xf32>
    %15 = arith.divf %14, %13 : vector<2x8x128xf32>
    %cst_8 = arith.constant 0.000000e+00 : f32
    %16 = vector.broadcast %cst_8 : f32 to vector<2x8x128xf32>
    %17 = arith.cmpf oge, %0, %16 : vector<2x8x128xf32>
    %18 = arith.mulf %5, %15 : vector<2x8x128xf32>
    %19 = arith.select %17, %15, %18 : vector<2x8x128xi1>, vector<2x8x128xf32>
    %20 = arith.subf %19, %1 : vector<2x8x128xf32>
    %cst_9 = arith.constant 1.000000e+00 : f32
    %21 = vector.broadcast %cst_9 : f32 to vector<2x8x128xf32>
    %22 = arith.subf %20, %21 : vector<2x8x128xf32>
    %cst_10 = arith.constant 5.010000e-02 : f32
    %23 = vector.broadcast %cst_10 : f32 to vector<2x8x128xf32>
    %24 = arith.divf %22, %23 : vector<2x8x128xf32>
    %25 = math.exp %24 : vector<2x8x128xf32>
    %cst_11 = arith.constant 1.000000e+00 : f32
    %26 = vector.broadcast %cst_11 : f32 to vector<2x8x128xf32>
    %27 = arith.subf %26, %25 : vector<2x8x128xf32>
    %28 = arith.mulf %11, %27 : vector<2x8x128xf32>
    %cst_12 = arith.constant dense<0.000000e+00> : vector<8x128xf32>
    %29 = vector.multi_reduction <add>, %28, %cst_12 [0] : vector<2x8x128xf32> to vector<8x128xf32>
    %c0_13 = arith.constant 0 : index
    %c0_14 = arith.constant 0 : index
    %c0_15 = arith.constant 0 : index
    %30 = vector.load %arg3[%c0_13, %c0_14, %c0_15] : memref<1x8x128xf32, #tpu.memory_space<vmem>>, vector<1x8x128xf32>
    %31 = vector.shape_cast %30 : vector<1x8x128xf32> to vector<8x128xf32>
    %32 = vector.shape_cast %29 : vector<8x128xf32> to vector<1x8x128xf32>
    tpu.vector_store %arg3[%c0_13, %c0_14, %c0_15], %32 {strides = array<i32>} : memref<1x8x128xf32, #tpu.memory_space<vmem>>, vector<1x8x128xf32>,
    return
  }
  func.func @transform_0(%arg0: i32) -> (i32, i32, i32) {
    %c0_i32 = arith.constant 0 : i32
    %c0_i32_0 = arith.constant 0 : i32
    %c0_i32_1 = arith.constant 0 : i32
    return %arg0, %c0_i32, %c0_i32_0 : i32, i32, i32
  }
  func.func @transform_1(%arg0: i32) -> (i32, i32, i32) {
    %c0_i32 = arith.constant 0 : i32
    %c0_i32_0 = arith.constant 0 : i32
    %c0_i32_1 = arith.constant 0 : i32
    return %arg0, %c0_i32, %c0_i32_0 : i32, i32, i32
  }
  func.func @transform_2(%arg0: i32) -> (i32, i32, i32) {
    %c0_i32 = arith.constant 0 : i32
    %c0_i32_0 = arith.constant 0 : i32
    %c0_i32_1 = arith.constant 0 : i32
    return %arg0, %c0_i32, %c0_i32_0 : i32, i32, i32
  }
}

</mosaic_0001>

<bundles_post_ra>
// kernel: tpu_custom_call.1
= control target key start
LH: loop header
LB: loop body
LE: loop exit
PB: predicated region body
PF: predicated region fallthrough
CT: control target
= control target key end

     0   :  { %7 = vsyncpa [#allocation3], 0  ;;  %s241_s0 = inlined_call_operand.hbm [shape: f32[2,8,128], index: 0, kind: input, shape index: {}]   ;;  %s242_s1 = inlined_call_operand.hbm [shape: f32[2,8,128], index: 1, kind: input, shape index: {}]   ;;  %s243_s2 = inlined_call_operand.hbm [shape: f32[1,8,128], index: 2, kind: output, shape index: {}]  }
   0x1   :  { %8 = vsyncpa [#allocation6], 0 }
   0x2   :  { %9 = vsyncpa [#allocation4], 0  ;;  %s212_s9 = smov [#allocation2]  }
   0x3   :  { %s15_s10 = sshll.u32 %s212_s9, 4  ;;  %s16_s10 = int_to_ptr.vmem [resolvable:$true] %s15_s10 }
   0x4   :  { %s154_s11 = scalar_lea.vmem %s16_s10, 256  ;;  %p159_p1 = scmp.lt.s32.totalorder %s16_s10, %s16_s10 }
   0x5   :  { %p155_p0 = scmp.ne.s32.totalorder %s16_s10, %s154_s11  ;;  %p160_p2 = scmp.lt.s32.totalorder %s154_s11, %s154_s11 }
   0x7   :  { %p161_p3 = por %p160_p2, %p159_p1 }
   0x9   :  { %p162_p4 = pnand %p161_p3, %p155_p0 }
   0xb   :  { %165 = shalt.err (!%p162_p4)
}
   0xc   :  { %s213_s12 = smov 128   ;;  %s214_s13 = smov 8  }
   0xd   :  { %21 = dma.hbm_to_vmem [thread:$0]  %s241_s0, 256, %s16_s10, [#allocation3], %s213_s12, %s213_s12, %s214_s13  }
   0xe   :  { %s215_s16 = smov [#allocation5]  }
   0xf   :  { %s27_s17 = sshll.u32 %s215_s16, 4  ;;  %s28_s17 = int_to_ptr.vmem [resolvable:$true] %s27_s17 }
  0x10   :  { %s174_s18 = scalar_lea.vmem %s28_s17, 256  ;;  %p179_p6 = scmp.lt.s32.totalorder %s28_s17, %s28_s17 }
  0x11   :  { %p175_p5 = scmp.ne.s32.totalorder %s28_s17, %s174_s18  ;;  %p180_p7 = scmp.lt.s32.totalorder %s174_s18, %s174_s18 }
  0x13   :  { %p181_p8 = por %p180_p7, %p179_p6 }
  0x15   :  { %p182_p9 = pnand %p181_p8, %p175_p5 }
  0x17   :  { %185 = shalt.err (!%p182_p9)
}
  0x18   :  { %33 = dma.hbm_to_vmem [thread:$0]  %s242_s1, 256, %s28_s17, [#allocation6], %s213_s12, %s213_s12, %s214_s13  }
  0x19   :  { %206 = dma.done.wait [#allocation3], 256  }
  0x1a   :  { %207 = vsyncadd [#allocation3], 4294967040 }
  0x1b   :  { %208 = dma.done.wait [#allocation6], 256  }
  0x1c   :  { %209 = vsyncadd [#allocation6], 4294967040  ;;  %v40_v0 = vld [vmem:[#allocation2] sm:$0xff]  ;;  %v41_v1 = vld [vmem:[#allocation2 + $0x8] sm:$0xff]  ;;  %s216_s0 = smov [#allocation7]  }
  0x1d   :  { %v44_v2 = vand.u32 2147483647, %v40_v0  ;;  %v45_v3 = vand.u32 2147483647, %v41_v1  ;;  %vm84_vm0 = vcmp.ge.f32.partialorder %v40_v0, 0.0  ;;  %v42_v14 = vld [vmem:[#allocation5] sm:$0xff] }
  0x1e   :  { %vm85_vm1 = vcmp.ge.f32.partialorder %v41_v1, 0.0  ;;  %v43_v16 = vld [vmem:[#allocation5 + $0x8] sm:$0xff]  ;;  %v52_v36 = vmax.f32 %v40_v0, 0.0  ;;  %v54_v37 = vmul.f32 %v42_v14, %v40_v0  ;;  %v53_v38 = vmax.f32 %v41_v1, 0.0  ;;  %s113_s1 = sshll.u32 %s216_s0, 4  ;;  %s114_s1 = int_to_ptr.vmem [resolvable:$true] %s113_s1 }
  0x1f   :  { %v46_v4 = vsub.f32 0.0, %v44_v2  ;;  %v47_v5 = vsub.f32 0.0, %v45_v3  ;;  %v55_v39 = vmul.f32 %v43_v16, %v41_v1  ;;  %s186_s21 = scalar_lea.vmem %s114_s1, 128  ;;  %p191_p11 = scmp.lt.s32.totalorder %s114_s1, %s114_s1 }
  0x20   :  { %v56_v44 = vsub.f32 %v52_v36, %v54_v37  ;;  %p187_p10 = scmp.ne.s32.totalorder %s114_s1, %s186_s21  ;;  %p192_p12 = scmp.lt.s32.totalorder %s186_s21, %s186_s21 }
  0x21   :  { %v48_v6 = vmul.f32 1.442695, %v46_v4  ;;  %v50_v7 = vmul.f32 1.442695, %v47_v5  ;;  %v57_v45 = vsub.f32 %v53_v38, %v55_v39 }
  0x22   :  { %p193_p13 = por %p192_p12, %p191_p11 }
  0x23   :  { %130 = vpow2.f32 %v48_v6 }
  0x24   :  { %132 = vpow2.f32 %v50_v7  ;;  %p194_p0 = pnand %p193_p13, %p187_p10 }
  0x30   :  { %v131_v8 = vpop.eup %130 }
  0x31   :  { %v133_v9 = vpop.eup %132  ;;  %v58_v10 = vadd.f32 1.0, %v131_v8  ;;  %v61_v25 = vmul.f32 -0.5, %v131_v8  ;;  %v64_v32 = vand.u32 2147483647, %v131_v8 }
  0x32   :  { %v67_v11 = vadd.f32 1.0, %v133_v9  ;;  %v70_v27 = vmul.f32 -0.5, %v133_v9  ;;  %v73_v35 = vand.u32 2147483647, %v133_v9 }
  0x33   :  { %134 = vrcp.f32 %v58_v10  ;;  %v62_v30 = vadd.f32 1.0, %v61_v25  ;;  %vm65_vm2 = vcmp.lt.f32.partialorder %v64_v32, 0.0004427343 }
  0x34   :  { %136 = vrcp.f32 %v67_v11  ;;  %v71_v33 = vadd.f32 1.0, %v70_v27  ;;  %vm74_vm3 = vcmp.lt.f32.partialorder %v73_v35, 0.0004427343 }
  0x35   :  { %138 = vlog2.f32 %v58_v10  ;;  %v63_v41 = vmul.f32 %v131_v8, %v62_v30 }
  0x36   :  { %140 = vlog2.f32 %v67_v11  ;;  %v72_v43 = vmul.f32 %v133_v9, %v71_v33 }
  0x40   :  { %v135_v12 = vpop.eup %134 }
  0x41   :  { %v137_v13 = vpop.eup %136  ;;  %v86_v15 = vmul.f32 %v135_v12, %v131_v8 }
  0x42   :  { %v87_v17 = vmul.f32 %v137_v13, %v133_v9  ;;  %v139_v31 = vpop.eup %138 }
  0x43   :  { %v88_v18 = vsel %vm84_vm0, %v135_v12, %v86_v15  ;;  %v141_v34 = vpop.eup %140  ;;  %v60_v40 = vmul.f32 0.6931472, %v139_v31 }
  0x44   :  { %v89_v19 = vsel %vm85_vm1, %v137_v13, %v87_v17  ;;  %v90_v20 = vsub.f32 %v88_v18, %v42_v14  ;;  %v69_v42 = vmul.f32 0.6931472, %v141_v34 }
  0x45   :  { %v91_v21 = vsub.f32 %v89_v19, %v43_v16  ;;  %v66_v46 = vsel %vm65_vm2, %v63_v41, %v60_v40 }
  0x46   :  { %v123_v22 = vadd.f32 -1.0, %v90_v20  ;;  %v75_v47 = vsel %vm74_vm3, %v72_v43, %v69_v42  ;;  %v76_v48 = vadd.f32 %v66_v46, %v56_v44 }
  0x47   :  { %v124_v23 = vadd.f32 -1.0, %v91_v21  ;;  %v77_v50 = vadd.f32 %v75_v47, %v57_v45 }
  0x48   :  { %v95_v24 = vmul.f32 19.960081, %v123_v22 }
  0x49   :  { %v96_v26 = vmul.f32 19.960081, %v124_v23 }
  0x4a   :  { %v97_v28 = vmul.f32 1.442695, %v95_v24 }
  0x4b   :  { %v99_v29 = vmul.f32 1.442695, %v96_v26 }
  0x4c   :  { %142 = vpow2.f32 %v97_v28 }
  0x4d   :  { %144 = vpow2.f32 %v99_v29 }
  0x59   :  { %v143_v49 = vpop.eup %142 }
  0x5a   :  { %v145_v51 = vpop.eup %144  ;;  %v101_v52 = vsub.f32 1.0, %v143_v49 }
  0x5b   :  { %v102_v53 = vsub.f32 1.0, %v145_v51 }
  0x5c   :  { %v103_v54 = vmul.f32 %v101_v52, %v76_v48 }
  0x5d   :  { %v104_v55 = vmul.f32 %v102_v53, %v77_v50 }
  0x5f   :  { %v105_v56 = vadd.f32 %v104_v55, %v103_v54 }
  0x61   :  { %106 = vst [vmem:[#allocation7] sm:$0xff] %v105_v56 }
  0x62   :  { %197 = shalt.err (!%p194_p0)
}
  0x63   :  { %116 = dma.vmem_to_hbm [thread:$0]  %s114_s1, 128, %s243_s2, [#allocation4]  }
  0x64   :  { %210 = dma.done.wait [#allocation4], 128  }
  0x65   :  { %211 = vsyncadd [#allocation4], 4294967168 }
  0x66   :  { %120 = vsyncpa [#allocation3], 1 }
  0x67   :  { %121 = vsyncpa [#allocation6], 1 }
  0x68   :  { %122 = vsyncpa [#allocation4], 1 }

</bundles_post_ra>
